<compile_context>
chip_gen: v7x
topology: tpu7x:2x2x1
jax: 0.10.0
libtpu: 0.0.40
codegen_flags: <defaults>
</compile_context>

<pallas_src>
import functools

import jax
import jax.numpy as jnp
import numpy as np
from jax.experimental import pallas as pl
from jax.experimental.pallas import tpu as pltpu


def _round_up(x, m):
    return ((x + m - 1) // m) * m


# ----------------------------------------------------------------------------
# Kernel 1: fused two-layer MLP encoder(s) + embedding head(s)
#   refs layout: x_ref, [w1,b1,w2,b2] * n_sets, [out] * n_sets
# ----------------------------------------------------------------------------
def _mlp_kernel(x_ref, *refs):
    n_sets = len(refs) // 5
    x = x_ref[...]                                   # (tm, D) bf16, read once
    for s in range(n_sets):                          # static 1 or 2 sets
        w1, b1, w2, b2 = refs[4 * s: 4 * s + 4]
        out = refs[4 * n_sets + s]
        # MXU: bf16 x bf16 -> f32 accumulate
        h = jnp.dot(x, w1[...], preferred_element_type=jnp.float32)
        h = jnp.maximum(h + b1[...], 0.0)            # f32 bias + ReLU (VPU)
        o = jnp.dot(h.astype(jnp.bfloat16), w2[...],
                    preferred_element_type=jnp.float32)
        out[...] = o + b2[...]
    # TODO(synk): optional lane-dense repack of the (tm, L=16) output into a
    # (tm//8, 128) slab to avoid masked partial stores (verify no XLU cost).


def mlp_embed(Xb, weight_sets, *, tm=256):
    """Xb: (N, D) bf16.  weight_sets: list of (W1_bf16, b1_f32(1,H), W2_bf16, b2_f32(1,L))."""
    N, D = Xb.shape
    n_sets = len(weight_sets)
    H = weight_sets[0][0].shape[1]
    L = weight_sets[0][2].shape[1]

    # Ragged N: padded wrapper (grid = cdiv), no divisibility restriction.
    tm_eff = min(tm, _round_up(N, 8))
    N_pad = _round_up(N, tm_eff)
    if N_pad != N:
        Xb = jnp.pad(Xb, ((0, N_pad - N), (0, 0)))

    flat = []
    in_specs = [pl.BlockSpec((tm_eff, D), lambda i: (i, 0))]
    for (w1, b1, w2, b2) in weight_sets:
        flat += [w1, b1, w2, b2]
        in_specs += [
            pl.BlockSpec((D, H), lambda i: (0, 0)),
            pl.BlockSpec((1, H), lambda i: (0, 0)),
            pl.BlockSpec((H, L), lambda i: (0, 0)),
            pl.BlockSpec((1, L), lambda i: (0, 0)),
        ]
    out_shapes = [jax.ShapeDtypeStruct((N_pad, L), jnp.float32)] * n_sets
    out_specs = [pl.BlockSpec((tm_eff, L), lambda i: (i, 0))] * n_sets

    outs = pl.pallas_call(
        _mlp_kernel,
        out_shape=out_shapes,
        grid=(N_pad // tm_eff,),
        in_specs=in_specs,
        out_specs=out_specs,
        compiler_params=pltpu.CompilerParams(
            dimension_semantics=("parallel",),
            vmem_limit_bytes=48 * 1024 * 1024),
    )(Xb, *flat)
    if not isinstance(outs, (tuple, list)):
        outs = (outs,)
    return tuple(o[:N] for o in outs)


# ----------------------------------------------------------------------------
# Kernel 2: blocked edge similarity
#   similarity[e] = sum_l emb_i[u_i[e], l] * emb_j[u_j[e], l]
# Embeddings stay in HBM; rows are DMA-gathered per edge block.
# ----------------------------------------------------------------------------
def _sim_kernel(tb, ui_ref, uj_ref, emb_i_hbm, emb_j_hbm, out_ref,
                ei_buf, ej_buf, sem):
    base = pl.program_id(0) * tb

    # Start all row-gather DMAs for this edge block (overlap issue/complete).
    for t in range(tb):                      # static small block size (not B)
        ii = ui_ref[base + t]
        jj = uj_ref[base + t]
        pltpu.make_async_copy(emb_i_hbm.at[pl.ds(ii, 1), :],
                              ei_buf.at[pl.ds(t, 1), :], sem.at[0, t]).start()
        pltpu.make_async_copy(emb_j_hbm.at[pl.ds(jj, 1), :],
                              ej_buf.at[pl.ds(t, 1), :], sem.at[1, t]).start()
    # Wait for all of them.
    for t in range(tb):
        pltpu.make_async_copy(emb_i_hbm.at[pl.ds(0, 1), :],
                              ei_buf.at[pl.ds(t, 1), :], sem.at[0, t]).wait()
        pltpu.make_async_copy(emb_j_hbm.at[pl.ds(0, 1), :],
                              ej_buf.at[pl.ds(t, 1), :], sem.at[1, t]).wait()

    prod = ei_buf[...].astype(jnp.float32) * ej_buf[...].astype(jnp.float32)
    out_ref[...] = jnp.sum(prod, axis=1, keepdims=True)      # (tb, 1)


def edge_similarity(u_i, u_j, emb_i, emb_j, *, tb=16):
    B = u_i.shape[0]
    N, L = emb_i.shape
    tb = min(tb, _round_up(B, 8))
    B_pad = _round_up(B, tb)

    ui = jnp.zeros((B_pad,), jnp.int32).at[:B].set(u_i.astype(jnp.int32))
    uj = jnp.zeros((B_pad,), jnp.int32).at[:B].set(u_j.astype(jnp.int32))

    out = pl.pallas_call(
        functools.partial(_sim_kernel, tb),
        out_shape=jax.ShapeDtypeStruct((B_pad, 1), jnp.float32),
        grid_spec=pltpu.PrefetchScalarGridSpec(
            num_scalar_prefetch=2,                 # u_i, u_j -> SMEM
            grid=(B_pad // tb,),
            in_specs=[pl.BlockSpec(memory_space=pl.ANY),   # emb_i stays in HBM
                      pl.BlockSpec(memory_space=pl.ANY)],  # emb_j stays in HBM
            out_specs=pl.BlockSpec((tb, 1), lambda b, ui, uj: (b, 0)),
            scratch_shapes=[pltpu.VMEM((tb, L), emb_i.dtype),
                            pltpu.VMEM((tb, L), emb_j.dtype),
                            pltpu.SemaphoreType.DMA((2, tb))],
        ),
        compiler_params=pltpu.CompilerParams(
            dimension_semantics=("parallel",)),    # edge blocks split across TCs
    )(ui, uj, emb_i, emb_j)
    return out[:B, 0]


# ----------------------------------------------------------------------------
# Parameter preparation (hoisted out of the forward hot path)
# ----------------------------------------------------------------------------
def prepare_params(params):
    prep = {}
    for k, v in params.items():
        if k.startswith("b") or k.startswith("cb"):          # biases
            prep[k] = v.reshape(1, -1).astype(jnp.float32)
        else:                                                 # weights
            prep[k] = v.astype(jnp.bfloat16)
    return prep


# ----------------------------------------------------------------------------
# LACE forward (mirrors LACE.forward)
# ----------------------------------------------------------------------------
def lace_forward(prepared, Xb, u_i, u_j, proximity="first-order"):
    enc = (prepared["W1"], prepared["b1"], prepared["W2"], prepared["b2"])
    if proximity == "first-order":
        (embedding,) = mlp_embed(Xb, [enc])
        context_embedding = None
        # emb_i is emb_j: only per-edge rows are gathered, so no full-matrix
        # double DMA happens here.
        similarity = edge_similarity(u_i, u_j, embedding, embedding)
    else:
        ctx = (prepared["cW1"], prepared["cb1"], prepared["cW2"], prepared["cb2"])
        # Fused call: X tile read from HBM once for both MLPs.
        embedding, context_embedding = mlp_embed(Xb, [enc, ctx])
        similarity = edge_similarity(u_i, u_j, embedding, context_embedding)
    return similarity, embedding, context_embedding


# ----------------------------------------------------------------------------
# Pure-JAX reference (PyTorch forward math; mirrors the bf16 input rounding)
# ----------------------------------------------------------------------------
def lace_forward_ref(prepared, Xb, u_i, u_j, proximity="first-order"):
    x = Xb.astype(jnp.float32)

    def mlp(w1, b1, w2, b2):
        h = jnp.maximum(x @ w1.astype(jnp.float32) + b1, 0.0)
        h = h.astype(jnp.bfloat16).astype(jnp.float32)
        return h @ w2.astype(jnp.float32) + b2

    emb = mlp(prepared["W1"], prepared["b1"], prepared["W2"], prepared["b2"])
    if proximity == "first-order":
        ctx = None
        uj_emb = emb[u_j]
    else:
        ctx = mlp(prepared["cW1"], prepared["cb1"], prepared["cW2"], prepared["cb2"])
        uj_emb = ctx[u_j]
    sim = jnp.sum(emb[u_i] * uj_emb, axis=1)
    return sim, emb, ctx


if __name__ == "__main__":
    # Small, forward-consistent shapes: N nodes, D features, hidden=512, L emb.
    N, D, H, L, B = 64, 32, 512, 16, 8

    key = jax.random.PRNGKey(0)
    kx, km, k1, k2, k3, k4, k5, k6, k7, k8, ki, kj = jax.random.split(key, 12)

    # "Sparse" X: dense (to_dense of the sparse buffer) with ~70% zeros.
    X = jax.random.normal(kx, (N, D), dtype=jnp.float32)
    X = X * (jax.random.uniform(km, (N, D)) < 0.3).astype(jnp.float32)

    def init_linear(kw, kb, fan_in, fan_out):
        w = jax.random.normal(kw, (fan_in, fan_out), jnp.float32) / np.sqrt(fan_in)
        b = jax.random.normal(kb, (fan_out,), jnp.float32) * 0.01
        return w, b

    W1, b1 = init_linear(k1, k2, D, H)     # encoder: Linear(D, 512)
    W2, b2 = init_linear(k3, k4, H, L)     # embedding_layer: Linear(512, L)
    cW1, cb1 = init_linear(k5, k6, D, H)   # context_encoder
    cW2, cb2 = init_linear(k7, k8, H, L)   # context_embedding_layer
    params = dict(W1=W1, b1=b1, W2=W2, b2=b2,
                  cW1=cW1, cb1=cb1, cW2=cW2, cb2=cb2)

    # Hoisted (once, outside the hot path): weight casts + bias reshapes + X cast.
    prepared = prepare_params(params)
    Xb = X.astype(jnp.bfloat16)

    u_i = jax.random.randint(ki, (B,), 0, N, dtype=jnp.int32)
    u_j = jax.random.randint(kj, (B,), 0, N, dtype=jnp.int32)

    # ---- first-order proximity ----
    sim, emb, ctx = lace_forward(prepared, Xb, u_i, u_j, proximity="first-order")
    jax.block_until_ready(sim)
    jax.block_until_ready(emb)
    assert ctx is None

    sim_ref, emb_ref, _ = lace_forward_ref(prepared, Xb, u_i, u_j, "first-order")
    np.testing.assert_allclose(np.asarray(emb), np.asarray(emb_ref),
                               rtol=2e-2, atol=2e-2)
    np.testing.assert_allclose(np.asarray(sim), np.asarray(sim_ref),
                               rtol=2e-2, atol=2e-2)
    # Gather kernel exactness check (same embedding values on both sides).
    sim_gather_ref = jnp.sum(emb[u_i] * emb[u_j], axis=1)
    np.testing.assert_allclose(np.asarray(sim), np.asarray(sim_gather_ref),
                               rtol=1e-5, atol=1e-5)

    # ---- second-order proximity (fused embedding + context pass) ----
    sim2, emb2, ctx2 = lace_forward(prepared, Xb, u_i, u_j, proximity="second-order")
    jax.block_until_ready(sim2)
    jax.block_until_ready(ctx2)
    sim2_ref, emb2_ref, ctx2_ref = lace_forward_ref(prepared, Xb, u_i, u_j,
                                                    "second-order")
    np.testing.assert_allclose(np.asarray(emb2), np.asarray(emb2_ref),
                               rtol=2e-2, atol=2e-2)
    np.testing.assert_allclose(np.asarray(ctx2), np.asarray(ctx2_ref),
                               rtol=2e-2, atol=2e-2)
    np.testing.assert_allclose(np.asarray(sim2), np.asarray(sim2_ref),
                               rtol=2e-2, atol=2e-2)

    # TODO(synk): training-side pieces (Adam optimizer, compute_loss,
    # validation-energy bookkeeping) are out of scope for the forward kernel.
    print("KERNEL_OK")
</pallas_src>

<mosaic_0001>
module attributes {stable_mosaic.version = 11 : i64} {
  func.func @_mlp_kernel(%arg0: i32, %arg1: memref<64x32xbf16, #tpu.memory_space<vmem>>, %arg2: memref<32x512xbf16, #tpu.memory_space<vmem>>, %arg3: memref<1x512xf32, #tpu.memory_space<vmem>>, %arg4: memref<512x16xbf16, #tpu.memory_space<vmem>>, %arg5: memref<1x16xf32, #tpu.memory_space<vmem>>, %arg6: memref<64x16xf32, #tpu.memory_space<vmem>>) attributes {dimension_semantics = [#tpu.dimension_semantics<parallel>], iteration_bounds = array<i64: 1>, scalar_prefetch = 0 : i64, scratch_operands = 0 : i64, tpu.core_type = #tpu.core_type<tc>, window_params = [{transform_indices = @transform_0, window_bounds = array<i64: 64, 32>}, {pipeline_mode = #tpu.pipeline_mode<synchronous>, transform_indices = @transform_1, window_bounds = array<i64: 32, 512>}, {pipeline_mode = #tpu.pipeline_mode<synchronous>, transform_indices = @transform_2, window_bounds = array<i64: 1, 512>}, {pipeline_mode = #tpu.pipeline_mode<synchronous>, transform_indices = @transform_3, window_bounds = array<i64: 512, 16>}, {pipeline_mode = #tpu.pipeline_mode<synchronous>, transform_indices = @transform_4, window_bounds = array<i64: 1, 16>}, {transform_indices = @transform_5, window_bounds = array<i64: 64, 16>}]} {
    %c0 = arith.constant 0 : index
    %c0_0 = arith.constant 0 : index
    %0 = vector.load %arg1[%c0, %c0_0] : memref<64x32xbf16, #tpu.memory_space<vmem>>, vector<64x32xbf16>
    %c0_1 = arith.constant 0 : index
    %c0_2 = arith.constant 0 : index
    %1 = vector.load %arg2[%c0_1, %c0_2] : memref<32x512xbf16, #tpu.memory_space<vmem>>, vector<32x512xbf16>
    %cst = arith.constant dense<0.000000e+00> : vector<64x512xf32>
    %2 = tpu.matmul %0, %1, %cst {dimension_numbers = #tpu.dot_dimension_numbers<[1], [0], [0], [1], [0, 0, 1, 1], [], []>} : vector<64x32xbf16>, vector<32x512xbf16>, vector<64x512xf32> -> vector<64x512xf32>
    %c0_3 = arith.constant 0 : index
    %c0_4 = arith.constant 0 : index
    %3 = vector.load %arg3[%c0_3, %c0_4] : memref<1x512xf32, #tpu.memory_space<vmem>>, vector<1x512xf32>
    %4 = vector.broadcast %3 : vector<1x512xf32> to vector<64x512xf32>
    %5 = arith.addf %2, %4 : vector<64x512xf32>
    %cst_5 = arith.constant 0.000000e+00 : f32
    %6 = vector.broadcast %cst_5 : f32 to vector<64x512xf32>
    %7 = arith.maximumf %5, %6 : vector<64x512xf32>
    %8 = arith.truncf %7 : vector<64x512xf32> to vector<64x512xbf16>
    %c0_6 = arith.constant 0 : index
    %c0_7 = arith.constant 0 : index
    %9 = vector.load %arg4[%c0_6, %c0_7] : memref<512x16xbf16, #tpu.memory_space<vmem>>, vector<512x16xbf16>
    %cst_8 = arith.constant dense<0.000000e+00> : vector<64x16xf32>
    %10 = tpu.matmul %8, %9, %cst_8 {dimension_numbers = #tpu.dot_dimension_numbers<[1], [0], [0], [1], [0, 0, 1, 1], [], []>} : vector<64x512xbf16>, vector<512x16xbf16>, vector<64x16xf32> -> vector<64x16xf32>
    %c0_9 = arith.constant 0 : index
    %c0_10 = arith.constant 0 : index
    %11 = vector.load %arg5[%c0_9, %c0_10] : memref<1x16xf32, #tpu.memory_space<vmem>>, vector<1x16xf32>
    %12 = vector.broadcast %11 : vector<1x16xf32> to vector<64x16xf32>
    %13 = arith.addf %10, %12 : vector<64x16xf32>
    %c0_11 = arith.constant 0 : index
    %c0_12 = arith.constant 0 : index
    %14 = vector.load %arg6[%c0_11, %c0_12] : memref<64x16xf32, #tpu.memory_space<vmem>>, vector<64x16xf32>
    tpu.vector_store %arg6[%c0_11, %c0_12], %13 {strides = array<i32>} : memref<64x16xf32, #tpu.memory_space<vmem>>, vector<64x16xf32>,
    return
  }
  func.func @transform_0(%arg0: i32) -> (i32, i32) {
    %c0_i32 = arith.constant 0 : i32
    %c0_i32_0 = arith.constant 0 : i32
    return %arg0, %c0_i32 : i32, i32
  }
  func.func @transform_1(%arg0: i32) -> (i32, i32) {
    %c0_i32 = arith.constant 0 : i32
    %c0_i32_0 = arith.constant 0 : i32
    %c0_i32_1 = arith.constant 0 : i32
    return %c0_i32, %c0_i32_0 : i32, i32
  }
  func.func @transform_2(%arg0: i32) -> (i32, i32) {
    %c0_i32 = arith.constant 0 : i32
    %c0_i32_0 = arith.constant 0 : i32
    %c0_i32_1 = arith.constant 0 : i32
    return %c0_i32, %c0_i32_0 : i32, i32
  }
  func.func @transform_3(%arg0: i32) -> (i32, i32) {
    %c0_i32 = arith.constant 0 : i32
    %c0_i32_0 = arith.constant 0 : i32
    %c0_i32_1 = arith.constant 0 : i32
    return %c0_i32, %c0_i32_0 : i32, i32
  }
  func.func @transform_4(%arg0: i32) -> (i32, i32) {
    %c0_i32 = arith.constant 0 : i32
    %c0_i32_0 = arith.constant 0 : i32
    %c0_i32_1 = arith.constant 0 : i32
    return %c0_i32, %c0_i32_0 : i32, i32
  }
  func.func @transform_5(%arg0: i32) -> (i32, i32) {
    %c0_i32 = arith.constant 0 : i32
    %c0_i32_0 = arith.constant 0 : i32
    return %arg0, %c0_i32 : i32, i32
  }
}

</mosaic_0001>

<bundles_post_ra>
// kernel: tpu_custom_call.1
= control target key start
LH: loop header
LB: loop body
LE: loop exit
PB: predicated region body
PF: predicated region fallthrough
CT: control target
= control target key end

     0   :  { %v914_v1 = vmov 0   ;;  %vm119_vm0 = vcmask 261120   ;;  %v39_v45 = vlaneseq  ;;  %vm719_vm1 = vcmask 130048   ;;  %s1181_s1 = inlined_call_operand.vmem [shape: bf16[32,512], index: 1, kind: input, shape index: {}]   ;;  %s1182_s0 = inlined_call_operand.vmem [shape: bf16[64,32], index: 0, kind: input, shape index: {}]   ;;  %s1183_s3 = inlined_call_operand.vmem [shape: bf16[512,16], index: 3, kind: input, shape index: {}]   ;;  %s1184_s2 = inlined_call_operand.vmem [shape: f32[1,512], index: 2, kind: input, shape index: {}]   ;;  %s1185_s4 = inlined_call_operand.vmem [shape: f32[1,16], index: 4, kind: input, shape index: {}]   ;;  %s1186_s5 = inlined_call_operand.vmem [shape: f32[64,16], index: 5, kind: output, shape index: {}]  }
   0x1   :  { %v866_v0 = vld [vmem:[%s1181_s1 + $0x4] ss:$16 sps:$4 sm:$0xff]   ;;  %164 = vmatprep.mubr.bf16.mxu0 %v914_v1  ;;  %237 = vmatprep.mubr.bf16.mxu1 %v914_v1  ;;  %v868_v2 = vld [vmem:[%s1181_s1 + $0xc] ss:$16 sps:$4 sm:$0xff]   ;;  %v870_v3 = vld [vmem:[%s1181_s1] ss:$16 sps:$4 sm:$0xff]  }
   0x2   :  { %132 = vmatprep.subr.bf16.mxu0 %v866_v0  ;;  %v871_v4 = vld [vmem:[%s1181_s1 + $0x8] ss:$16 sps:$4 sm:$0xff]   ;;  %205 = vmatprep.subr.bf16.mxu1 %v868_v2  ;;  %v872_v5 = vld [vmem:[%s1181_s1 + $0x24] ss:$16 sps:$4 sm:$0xff]   ;;  %v874_v6 = vld [vmem:[%s1181_s1 + $0x2c] ss:$16 sps:$4 sm:$0xff]  }
   0x3   :  { %133 = vmatpush1.bf16.msra.mxu0 %v870_v3  ;;  %206 = vmatpush1.bf16.msra.mxu1 %v871_v4  ;;  %v876_v7 = vld [vmem:[%s1181_s1 + $0x20] ss:$16 sps:$4 sm:$0xff]   ;;  %v877_v8 = vld [vmem:[%s1181_s1 + $0x28] ss:$16 sps:$4 sm:$0xff]   ;;  %v40_v46 = vshrl.u32 %v39_v45, 7 }
   0x4   :  { %134 = vmatprep.subr.bf16.mxu0 %v872_v5  ;;  %207 = vmatprep.subr.bf16.mxu1 %v874_v6  ;;  %v878_v9 = vld [vmem:[%s1182_s0] sm:$0xff]   ;;  %v879_v13 = vld [vmem:[%s1182_s0 + $0x8] sm:$0xff]   ;;  %v890_v19 = vld [vmem:[%s1183_s3 + $0x50] sm:$0xff]  }
   0x5   :  { %v882_v10 = vld [vmem:[%s1183_s3 + $0x40] sm:$0xff]   ;;  %v886_v15 = vld [vmem:[%s1183_s3 + $0x48] sm:$0xff]   ;;  %v891_v20 = vld [vmem:[%s1183_s3 + $0x10] sm:$0xff]   ;;  %v41_v47 = vsub.s32 0, %v40_v46  ;;  %v49_v48 = vsub.s32 2, %v40_v46  ;;  %v45_v50 = vsub.s32 1, %v40_v46 }
   0x6   :  { %v883_v11 = vld [vmem:[%s1183_s3] sm:$0xff]   ;;  %v887_v16 = vld [vmem:[%s1183_s3 + $0x8] sm:$0xff]   ;;  %v892_v21 = vld [vmem:[%s1183_s3 + $0xd0] sm:$0xff]   ;;  %v53_v51 = vsub.s32 3, %v40_v46 }
   0x7   :  { %135 = vmatpush1.bf16.msra.mxu0 %v876_v7  ;;  %208 = vmatpush1.bf16.msra.mxu1 %v877_v8  ;;  %v884_v12 = vld [vmem:[%s1183_s3 + $0xc0] sm:$0xff]   ;;  %v888_v17 = vld [vmem:[%s1183_s3 + $0xc8] sm:$0xff]   ;;  %v880_v22 = vld [vmem:[%s1182_s0 + $0x10] sm:$0xff]  }
   0x8   :  { %785 = vmatprep.subr.bf16.mxu0 %v882_v10  ;;  %v885_v14 = vld [vmem:[%s1183_s3 + $0x80] sm:$0xff]   ;;  %825 = vmatprep.subr.bf16.mxu1 %v884_v12  ;;  %v889_v18 = vld [vmem:[%s1183_s3 + $0x88] sm:$0xff]   ;;  %v893_v23 = vld [vmem:[%s1183_s3 + $0x90] sm:$0xff]  }
   0x9   :  { %v894_v24 = vld [vmem:[%s1183_s3 + $0x58] sm:$0xff]   ;;  %v898_v28 = vld [vmem:[%s1183_s3 + $0x60] sm:$0xff]   ;;  %v902_v33 = vld [vmem:[%s1183_s3 + $0x68] sm:$0xff]  }
   0xa   :  { %744 = vmatmul.mubr.msk.bf16.vlgmr.msra.gmra.mrb[0].mxu0 %vm119_vm0, %v878_v9  ;;  %748 = vmatmul.mubr.msk.bf16.vlgmr.msra.gmra.mrb[0].mxu1 %vm119_vm0, %v878_v9  ;;  %v895_v25 = vld [vmem:[%s1183_s3 + $0x18] sm:$0xff]   ;;  %v899_v29 = vld [vmem:[%s1183_s3 + $0x20] sm:$0xff]   ;;  %v903_v34 = vld [vmem:[%s1183_s3 + $0x28] sm:$0xff]  }
   0xb   :  { %174 = vmatprep.mubr.bf16.mxu0 %v914_v1  ;;  %247 = vmatprep.mubr.bf16.mxu1 %v914_v1  ;;  %v896_v26 = vld [vmem:[%s1183_s3 + $0xd8] sm:$0xff]   ;;  %v900_v30 = vld [vmem:[%s1183_s3 + $0xe0] sm:$0xff]   ;;  %v904_v35 = vld [vmem:[%s1183_s3 + $0xe8] sm:$0xff]  }
   0xc   :  { %786 = vmatpush3.bf16.msra.mxu0 %v883_v11  ;;  %826 = vmatpush3.bf16.msra.mxu1 %v885_v14  ;;  %v897_v27 = vld [vmem:[%s1183_s3 + $0x98] sm:$0xff]   ;;  %v901_v32 = vld [vmem:[%s1183_s3 + $0xa0] sm:$0xff]   ;;  %v905_v36 = vld [vmem:[%s1183_s3 + $0xa8] sm:$0xff]  }
   0xd   :  { %787 = vmatprep.subr.bf16.mxu0 %v886_v15  ;;  %827 = vmatprep.subr.bf16.mxu1 %v888_v17  ;;  %v881_v31 = vld [vmem:[%s1182_s0 + $0x18] sm:$0xff]   ;;  %v906_v37 = vld [vmem:[%s1183_s3 + $0x70] sm:$0xff]   ;;  %v37_v49 = vld [vmem:[%s1184_s2] sm:$0xf] }
   0xe   :  { %v908_v38 = vld [vmem:[%s1183_s3 + $0xf0] sm:$0xff]   ;;  %v910_v41 = vld [vmem:[%s1183_s3 + $0x78] sm:$0xff]   ;;  %v1096_v52 = vrot.slane %v37_v49, %v41_v47  ;;  %v1098_v53 = vrot.slane %v37_v49, %v49_v48  ;;  %v1100_v54 = vrot.slane %v37_v49, %v45_v50  ;;  %v1102_v55 = vrot.slane %v37_v49, %v53_v51 }
   0xf   :  { %v907_v39 = vld [vmem:[%s1183_s3 + $0x30] sm:$0xff]   ;;  %v912_v42 = vld [vmem:[%s1183_s3 + $0xf8] sm:$0xff]  }
  0x10   :  { %788 = vmatpush3.bf16.msra.mxu0 %v887_v16  ;;  %828 = vmatpush3.bf16.msra.mxu1 %v889_v18  ;;  %v909_v40 = vld [vmem:[%s1183_s3 + $0xb0] sm:$0xff]   ;;  %v911_v43 = vld [vmem:[%s1183_s3 + $0x38] sm:$0xff]  }
  0x11   :  { %789 = vmatprep.subr.bf16.mxu0 %v890_v19  ;;  %829 = vmatprep.subr.bf16.mxu1 %v892_v21  ;;  %v913_v44 = vld [vmem:[%s1183_s3 + $0xb8] sm:$0xff]  }
  0x12   :  { %745 = vmatmul.mubr.msk.bf16.gmra.mrb[4].mxu0 %vm119_vm0, %v879_v13  ;;  %749 = vmatmul.mubr.msk.bf16.gmra.mrb[4].mxu1 %vm119_vm0, %v879_v13 }
  0x13   :  { %184 = vmatprep.mubr.bf16.mxu0 %v914_v1  ;;  %257 = vmatprep.mubr.bf16.mxu1 %v914_v1 }
  0x14   :  { %790 = vmatpush3.bf16.msra.mxu0 %v891_v20  ;;  %830 = vmatpush3.bf16.msra.mxu1 %v893_v23 }
  0x15   :  { %791 = vmatprep.subr.bf16.mxu0 %v894_v24  ;;  %831 = vmatprep.subr.bf16.mxu1 %v896_v26 }
  0x18   :  { %792 = vmatpush3.bf16.msra.mxu0 %v895_v25  ;;  %832 = vmatpush3.bf16.msra.mxu1 %v897_v27 }
  0x19   :  { %793 = vmatprep.subr.bf16.mxu0 %v898_v28  ;;  %833 = vmatprep.subr.bf16.mxu1 %v900_v30 }
  0x1a   :  { %746 = vmatmul.mubr.msk.bf16.gmra.mrb[8].mxu0 %vm119_vm0, %v880_v22  ;;  %750 = vmatmul.mubr.msk.bf16.gmra.mrb[8].mxu1 %vm119_vm0, %v880_v22 }
  0x1b   :  { %194 = vmatprep.mubr.bf16.mxu0 %v914_v1  ;;  %267 = vmatprep.mubr.bf16.mxu1 %v914_v1 }
  0x1c   :  { %794 = vmatpush3.bf16.msra.mxu0 %v899_v29  ;;  %834 = vmatpush3.bf16.msra.mxu1 %v901_v32 }
  0x1d   :  { %795 = vmatprep.subr.bf16.mxu0 %v902_v33  ;;  %835 = vmatprep.subr.bf16.mxu1 %v904_v35 }
  0x20   :  { %796 = vmatpush3.bf16.msra.mxu0 %v903_v34  ;;  %836 = vmatpush3.bf16.msra.mxu1 %v905_v36 }
  0x21   :  { %797 = vmatprep.subr.bf16.mxu0 %v906_v37  ;;  %837 = vmatprep.subr.bf16.mxu1 %v908_v38 }
  0x22   :  { %747 = vmatmul.mubr.msk.bf16.gmra.mrb[12].mxu0 %vm119_vm0, %v881_v31  ;;  %751 = vmatmul.mubr.msk.bf16.gmra.mrb[12].mxu1 %vm119_vm0, %v881_v31 }
  0x24   :  { %798 = vmatpush3.bf16.msra.mxu0 %v907_v39  ;;  %838 = vmatpush3.bf16.msra.mxu1 %v909_v40 }
  0x25   :  { %799 = vmatprep.subr.bf16.mxu0 %v910_v41  ;;  %839 = vmatprep.subr.bf16.mxu1 %v912_v42 }
  0x28   :  { %800 = vmatpush3.bf16.msra.mxu0 %v911_v43  ;;  %840 = vmatpush3.bf16.msra.mxu1 %v913_v44 }
  0xdd   :  { %v166_v56 = vpop.f32.mrb[0].mxu0  ;;  %v239_v57 = vpop.f32.mrb[0].mxu1 }
  0xde   :  { %v167_v58 = vadd.f32 %v166_v56, %v1096_v52  ;;  %v240_v59 = vadd.f32 %v239_v57, %v1098_v53  ;;  %v168_v60 = vpop.f32.mrb[1].mxu0  ;;  %v241_v61 = vpop.f32.mrb[1].mxu1 }
  0xdf   :  { %v169_v62 = vadd.f32 %v168_v60, %v1100_v54  ;;  %v242_v63 = vadd.f32 %v241_v61, %v1102_v55  ;;  %v170_v0 = vpop.f32.mrb[2].mxu0  ;;  %v243_v1 = vpop.f32.mrb[2].mxu1 }
  0xe0   :  { %v280_v2 = vmax.f32 %v240_v59, 0.0  ;;  %v171_v3 = vadd.f32 %v170_v0, %v1096_v52  ;;  %v244_v4 = vadd.f32 %v243_v1, %v1098_v53  ;;  %v172_v5 = vpop.f32.mrb[3].mxu0  ;;  %v245_v6 = vpop.f32.mrb[3].mxu1  ;;  %v278_v10 = vmax.f32 %v167_v58, 0.0 }
  0xe1   :  { %v281_v7 = vmax.f32 %v242_v63, 0.0  ;;  %v173_v8 = vadd.f32 %v172_v5, %v1100_v54  ;;  %v246_v9 = vadd.f32 %v245_v6, %v1102_v55  ;;  %v279_v13 = vmax.f32 %v169_v62, 0.0 }
  0xe2   :  { %v282_v11 = vmax.f32 %v171_v3, 0.0  ;;  %v284_v12 = vmax.f32 %v244_v4, 0.0 }
  0xe3   :  { %v283_v14 = vmax.f32 %v173_v8, 0.0  ;;  %v285_v15 = vmax.f32 %v246_v9, 0.0 }
  0xe4   :  { %v310_v16 = vpack.c.bf16 %v282_v11, %v278_v10  ;;  %v312_v17 = vpack.c.bf16 %v284_v12, %v280_v2 }
  0xe5   :  { %v311_v18 = vpack.c.bf16 %v283_v14, %v279_v13  ;;  %v313_v19 = vpack.c.bf16 %v285_v15, %v281_v7  ;;  %v176_v20 = vpop.f32.mrb[4].mxu0  ;;  %v249_v21 = vpop.f32.mrb[4].mxu1 }
  0xe6   :  { %v177_v22 = vadd.f32 %v176_v20, %v1096_v52  ;;  %v250_v23 = vadd.f32 %v249_v21, %v1098_v53  ;;  %v178_v24 = vpop.f32.mrb[5].mxu0  ;;  %v251_v25 = vpop.f32.mrb[5].mxu1 }
  0xe7   :  { %v179_v26 = vadd.f32 %v178_v24, %v1100_v54  ;;  %v252_v27 = vadd.f32 %v251_v25, %v1102_v55  ;;  %v180_v28 = vpop.f32.mrb[6].mxu0  ;;  %v253_v29 = vpop.f32.mrb[6].mxu1  ;;  %621 = vmatprep.mubr.bf16.mxu0 %v311_v18  ;;  %686 = vmatprep.mubr.bf16.mxu1 %v313_v19 }
  0xe8   :  { %v288_v30 = vmax.f32 %v250_v23, 0.0  ;;  %v181_v31 = vadd.f32 %v180_v28, %v1096_v52  ;;  %v254_v32 = vadd.f32 %v253_v29, %v1098_v53  ;;  %v182_v33 = vpop.f32.mrb[7].mxu0  ;;  %v255_v34 = vpop.f32.mrb[7].mxu1  ;;  %622 = vmatmul.mubr.bf16.vlgmr.msra.gmra.mrb[16].mxu0 %v310_v16  ;;  %687 = vmatmul.mubr.bf16.vlgmr.msra.gmra.mrb[16].mxu1 %v312_v17  ;;  %v286_v38 = vmax.f32 %v177_v22, 0.0 }
  0xe9   :  { %v289_v35 = vmax.f32 %v252_v27, 0.0  ;;  %v183_v36 = vadd.f32 %v182_v33, %v1100_v54  ;;  %v256_v37 = vadd.f32 %v255_v34, %v1102_v55  ;;  %v287_v41 = vmax.f32 %v179_v26, 0.0 }
  0xea   :  { %v290_v39 = vmax.f32 %v181_v31, 0.0  ;;  %v292_v40 = vmax.f32 %v254_v32, 0.0 }
  0xeb   :  { %v291_v42 = vmax.f32 %v183_v36, 0.0  ;;  %v293_v43 = vmax.f32 %v256_v37, 0.0 }
  0xec   :  { %v314_v44 = vpack.c.bf16 %v290_v39, %v286_v38  ;;  %v316_v45 = vpack.c.bf16 %v292_v40, %v288_v30 }
  0xed   :  { %v315_v46 = vpack.c.bf16 %v291_v42, %v287_v41  ;;  %v317_v47 = vpack.c.bf16 %v293_v43, %v289_v35  ;;  %v186_v48 = vpop.f32.mrb[8].mxu0  ;;  %v259_v49 = vpop.f32.mrb[8].mxu1 }
  0xee   :  { %v187_v50 = vadd.f32 %v186_v48, %v1096_v52  ;;  %v260_v51 = vadd.f32 %v259_v49, %v1098_v53  ;;  %v188_v56 = vpop.f32.mrb[9].mxu0  ;;  %v261_v57 = vpop.f32.mrb[9].mxu1 }
  0xef   :  { %v189_v58 = vadd.f32 %v188_v56, %v1100_v54  ;;  %v262_v59 = vadd.f32 %v261_v57, %v1102_v55  ;;  %v190_v60 = vpop.f32.mrb[10].mxu0  ;;  %v263_v61 = vpop.f32.mrb[10].mxu1  ;;  %629 = vmatprep.mubr.bf16.mxu0 %v315_v46  ;;  %694 = vmatprep.mubr.bf16.mxu1 %v317_v47 }
  0xf0   :  { %v296_v62 = vmax.f32 %v260_v51, 0.0  ;;  %v191_v63 = vadd.f32 %v190_v60, %v1096_v52  ;;  %v264_v0 = vadd.f32 %v263_v61, %v1098_v53  ;;  %v192_v1 = vpop.f32.mrb[11].mxu0  ;;  %v265_v2 = vpop.f32.mrb[11].mxu1  ;;  %630 = vmatmul.mubr.bf16.gmra.mrb[20].mxu0 %v314_v44  ;;  %695 = vmatmul.mubr.bf16.gmra.mrb[20].mxu1 %v316_v45  ;;  %v294_v6 = vmax.f32 %v187_v50, 0.0 }
  0xf1   :  { %v297_v3 = vmax.f32 %v262_v59, 0.0  ;;  %v193_v4 = vadd.f32 %v192_v1, %v1100_v54  ;;  %v266_v5 = vadd.f32 %v265_v2, %v1102_v55  ;;  %v295_v9 = vmax.f32 %v189_v58, 0.0 }
  0xf2   :  { %v298_v7 = vmax.f32 %v191_v63, 0.0  ;;  %v300_v8 = vmax.f32 %v264_v0, 0.0 }
  0xf3   :  { %v299_v10 = vmax.f32 %v193_v4, 0.0  ;;  %v301_v11 = vmax.f32 %v266_v5, 0.0 }
  0xf4   :  { %v318_v12 = vpack.c.bf16 %v298_v7, %v294_v6  ;;  %v320_v13 = vpack.c.bf16 %v300_v8, %v296_v62 }
  0xf5   :  { %v319_v14 = vpack.c.bf16 %v299_v10, %v295_v9  ;;  %v321_v15 = vpack.c.bf16 %v301_v11, %v297_v3  ;;  %v196_v16 = vpop.f32.mrb[12].mxu0  ;;  %v269_v17 = vpop.f32.mrb[12].mxu1 }
  0xf6   :  { %v197_v18 = vadd.f32 %v196_v16, %v1096_v52  ;;  %v270_v19 = vadd.f32 %v269_v17, %v1098_v53  ;;  %v198_v20 = vpop.f32.mrb[13].mxu0  ;;  %v271_v21 = vpop.f32.mrb[13].mxu1 }
  0xf7   :  { %v199_v22 = vadd.f32 %v198_v20, %v1100_v54  ;;  %v272_v23 = vadd.f32 %v271_v21, %v1102_v55  ;;  %v200_v24 = vpop.f32.mrb[14].mxu0  ;;  %v273_v25 = vpop.f32.mrb[14].mxu1  ;;  %637 = vmatprep.mubr.bf16.mxu0 %v319_v14  ;;  %702 = vmatprep.mubr.bf16.mxu1 %v321_v15 }
  0xf8   :  { %v304_v26 = vmax.f32 %v270_v19, 0.0  ;;  %v201_v27 = vadd.f32 %v200_v24, %v1096_v52  ;;  %v274_v28 = vadd.f32 %v273_v25, %v1098_v53  ;;  %v202_v29 = vpop.f32.mrb[15].mxu0  ;;  %v275_v30 = vpop.f32.mrb[15].mxu1  ;;  %638 = vmatmul.mubr.bf16.gmra.mrb[24].mxu0 %v318_v12  ;;  %703 = vmatmul.mubr.bf16.gmra.mrb[24].mxu1 %v320_v13  ;;  %v302_v34 = vmax.f32 %v197_v18, 0.0 }
  0xf9   :  { %v305_v31 = vmax.f32 %v272_v23, 0.0  ;;  %v203_v32 = vadd.f32 %v202_v29, %v1100_v54  ;;  %v276_v33 = vadd.f32 %v275_v30, %v1102_v55  ;;  %v303_v37 = vmax.f32 %v199_v22, 0.0  ;;  %v1139_v54 = vld [vmem:[%s1185_s4] ss:$0 sm:$0xff] }
  0xfa   :  { %v306_v35 = vmax.f32 %v201_v27, 0.0  ;;  %v308_v36 = vmax.f32 %v274_v28, 0.0 }
  0xfb   :  { %v307_v38 = vmax.f32 %v203_v32, 0.0  ;;  %v309_v39 = vmax.f32 %v276_v33, 0.0 }
  0xfc   :  { %v322_v40 = vpack.c.bf16 %v306_v35, %v302_v34  ;;  %v324_v41 = vpack.c.bf16 %v308_v36, %v304_v26 }
  0xfd   :  { %v323_v52 = vpack.c.bf16 %v307_v38, %v303_v37  ;;  %v325_v42 = vpack.c.bf16 %v309_v39, %v305_v31 }
  0xff   :  { %645 = vmatprep.mubr.bf16.mxu0 %v323_v52  ;;  %710 = vmatprep.mubr.bf16.mxu1 %v325_v42 }
 0x100   :  { %646 = vmatmul.mubr.bf16.gmra.mrb[28].mxu0 %v322_v40  ;;  %711 = vmatmul.mubr.bf16.gmra.mrb[28].mxu1 %v324_v41 }
 0x1bb   :  { %v801_v53 = vpop.f32.mrb[16].mxu0  ;;  %v841_v43 = vpop.f32.mrb[16].mxu1 }
 0x1bc   :  { %v802_v55 = vpop.f32.mrb[17].mxu0  ;;  %v842_v44 = vpop.f32.mrb[17].mxu1 }
 0x1bd   :  { %v803_v45 = vadd.f32 %v802_v55, %v801_v53  ;;  %v843_v46 = vadd.f32 %v842_v44, %v841_v43  ;;  %v804_v47 = vpop.f32.mrb[18].mxu0  ;;  %v844_v48 = vpop.f32.mrb[18].mxu1 }
 0x1be   :  { %v805_v49 = vpop.f32.mrb[19].mxu0  ;;  %v845_v50 = vpop.f32.mrb[19].mxu1 }
 0x1bf   :  { %v624_v51 = vadd.f32 %v803_v45, %v1139_v54  ;;  %v806_v56 = vadd.f32 %v805_v49, %v804_v47  ;;  %v846_v57 = vadd.f32 %v845_v50, %v844_v48 }
 0x1c1   :  { %v689_v58 = vadd.f32 %v843_v46, %v624_v51  ;;  %v627_v59 = vadd.f32 %v806_v56, %v1139_v54 }
 0x1c3   :  { %720 = vst.msk [vmem:[%s1186_s5] sm:$0xff] %vm719_vm1, %v689_v58  ;;  %v692_v60 = vadd.f32 %v846_v57, %v627_v59  ;;  %v807_v61 = vpop.f32.mrb[20].mxu0  ;;  %v847_v62 = vpop.f32.mrb[20].mxu1 }
 0x1c4   :  { %v808_v63 = vpop.f32.mrb[21].mxu0  ;;  %v848_v0 = vpop.f32.mrb[21].mxu1 }
 0x1c5   :  { %721 = vst.msk [vmem:[%s1186_s5 + $0x8] sm:$0xff] %vm719_vm1, %v692_v60  ;;  %v809_v1 = vadd.f32 %v808_v63, %v807_v61  ;;  %v849_v2 = vadd.f32 %v848_v0, %v847_v62  ;;  %v810_v3 = vpop.f32.mrb[22].mxu0  ;;  %v850_v4 = vpop.f32.mrb[22].mxu1 }
 0x1c6   :  { %v811_v5 = vpop.f32.mrb[23].mxu0  ;;  %v851_v6 = vpop.f32.mrb[23].mxu1 }
 0x1c7   :  { %v632_v7 = vadd.f32 %v809_v1, %v1139_v54  ;;  %v812_v8 = vadd.f32 %v811_v5, %v810_v3  ;;  %v852_v9 = vadd.f32 %v851_v6, %v850_v4 }
 0x1c9   :  { %v697_v10 = vadd.f32 %v849_v2, %v632_v7  ;;  %v635_v11 = vadd.f32 %v812_v8, %v1139_v54 }
 0x1cb   :  { %722 = vst.msk [vmem:[%s1186_s5 + $0x10] sm:$0xff] %vm719_vm1, %v697_v10  ;;  %v700_v12 = vadd.f32 %v852_v9, %v635_v11  ;;  %v813_v13 = vpop.f32.mrb[24].mxu0  ;;  %v853_v14 = vpop.f32.mrb[24].mxu1 }
 0x1cc   :  { %v814_v15 = vpop.f32.mrb[25].mxu0  ;;  %v854_v16 = vpop.f32.mrb[25].mxu1 }
 0x1cd   :  { %723 = vst.msk [vmem:[%s1186_s5 + $0x18] sm:$0xff] %vm719_vm1, %v700_v12  ;;  %v815_v17 = vadd.f32 %v814_v15, %v813_v13  ;;  %v855_v18 = vadd.f32 %v854_v16, %v853_v14  ;;  %v816_v19 = vpop.f32.mrb[26].mxu0  ;;  %v856_v20 = vpop.f32.mrb[26].mxu1 }
 0x1ce   :  { %v817_v21 = vpop.f32.mrb[27].mxu0  ;;  %v857_v22 = vpop.f32.mrb[27].mxu1 }
 0x1cf   :  { %v640_v23 = vadd.f32 %v815_v17, %v1139_v54  ;;  %v818_v24 = vadd.f32 %v817_v21, %v816_v19  ;;  %v858_v25 = vadd.f32 %v857_v22, %v856_v20 }
 0x1d1   :  { %v705_v26 = vadd.f32 %v855_v18, %v640_v23  ;;  %v643_v27 = vadd.f32 %v818_v24, %v1139_v54 }
 0x1d3   :  { %724 = vst.msk [vmem:[%s1186_s5 + $0x20] sm:$0xff] %vm719_vm1, %v705_v26  ;;  %v708_v28 = vadd.f32 %v858_v25, %v643_v27  ;;  %v819_v29 = vpop.f32.mrb[28].mxu0  ;;  %v859_v30 = vpop.f32.mrb[28].mxu1 }
 0x1d4   :  { %v820_v31 = vpop.f32.mrb[29].mxu0  ;;  %v860_v32 = vpop.f32.mrb[29].mxu1 }
 0x1d5   :  { %725 = vst.msk [vmem:[%s1186_s5 + $0x28] sm:$0xff] %vm719_vm1, %v708_v28  ;;  %v821_v33 = vadd.f32 %v820_v31, %v819_v29  ;;  %v861_v34 = vadd.f32 %v860_v32, %v859_v30  ;;  %v822_v35 = vpop.f32.mrb[30].mxu0  ;;  %v862_v36 = vpop.f32.mrb[30].mxu1 }
 0x1d6   :  { %v823_v37 = vpop.f32.mrb[31].mxu0  ;;  %v863_v38 = vpop.f32.mrb[31].mxu1 }
 0x1d7   :  { %v648_v39 = vadd.f32 %v821_v33, %v1139_v54  ;;  %v824_v40 = vadd.f32 %v823_v37, %v822_v35  ;;  %v864_v41 = vadd.f32 %v863_v38, %v862_v36 }
 0x1d9   :  { %v713_v52 = vadd.f32 %v861_v34, %v648_v39  ;;  %v651_v42 = vadd.f32 %v824_v40, %v1139_v54 }
 0x1db   :  { %726 = vst.msk [vmem:[%s1186_s5 + $0x30] sm:$0xff] %vm719_vm1, %v713_v52  ;;  %v716_v53 = vadd.f32 %v864_v41, %v651_v42 }
 0x1dd   :  { %727 = vst.msk [vmem:[%s1186_s5 + $0x38] sm:$0xff] %vm719_vm1, %v716_v53 }

</bundles_post_ra>
